<compile_context>
chip_gen: v5e
topology: v5e:2x2
jax: 0.10.0
libtpu: 0.0.40
codegen_flags: <defaults>
</compile_context>

<pallas_src>
import functools

import jax
import jax.numpy as jnp
from jax.experimental import pallas as pl
from jax.experimental.pallas import tpu as pltpu


# ----------------------------- Pallas kernel --------------------------------

def _round_up(x, m):
    return ((x + m - 1) // m) * m


def _make_conv_bn_act_kernel(k, s, d, ow, act_type):
    """Fused conv (tap-row reduction) + folded BN + activation kernel."""

    def kernel(x_ref, w_ref, shift_ref, o_ref, acc_ref):
        # x_ref:     (1, 1, Wp, C1)     one padded NHWC input row (bf16)
        # w_ref:     (1, k, C1, C2pad)  BN-scale-folded weight for tap-row kh (bf16)
        # shift_ref: (1, C2pad)         beta - mean * gamma / sqrt(var + eps) (f32)
        # o_ref:     (1, 1, OW, C2pad)  output row
        # acc_ref:   (OW, C2pad) f32 scratch, persists across the kh grid axis
        kh = pl.program_id(2)

        @pl.when(kh == 0)
        def _init():
            acc_ref[...] = jnp.zeros_like(acc_ref)

        acc = acc_ref[...]
        for kw in range(k):
            if s == 1:
                a = x_ref[0, 0, pl.ds(kw * d, ow), :]              # (OW, C1)
            else:
                a = x_ref[0, 0, pl.ds(kw * d, ow, stride=s), :]    # (OW, C1)
            acc = acc + jnp.dot(a, w_ref[0, kw],
                                preferred_element_type=jnp.float32)
        acc_ref[...] = acc

        @pl.when(kh == pl.num_programs(2) - 1)
        def _finalize():
            y = acc_ref[...] + shift_ref[...]
            if act_type == 'silu':
                # exp -> EUP, approx reciprocal -> EUP (keeps the divide off the VPU)
                y = y * pl.reciprocal(1.0 + jnp.exp(-y), approx=True)
            elif act_type == 'lrelu':
                y = jnp.where(y >= 0.0, y, 0.1 * y)
            # act_type is None -> identity
            o_ref[0, 0] = y.astype(o_ref.dtype)

    return kernel


# ------------------------------- wrapper -------------------------------------

def conv_bn_act(x, weight, gamma, beta, running_mean, running_var, *,
                k=1, p=0, s=1, d=1, act_type='silu', eps=1e-5,
                mxu_dtype=jnp.bfloat16, depthwise=False):
    """Forward of Conv(c1, c2, k, p, s, d, act_type, depthwise=False).

    x:      (N, C1, H, W)   NCHW, float32
    weight: (C2, C1, k, k)  OIHW (PyTorch conv weight layout), no bias
    BatchNorm is applied in eval mode (folded running statistics).
    """
    assert not depthwise, "depthwise=True path not implemented"
    N, C1, H, W = x.shape
    C2 = weight.shape[0]
    OH = (H + 2 * p - d * (k - 1) - 1) // s + 1
    OW = (W + 2 * p - d * (k - 1) - 1) // s + 1
    Hp, Wp = H + 2 * p, W + 2 * p
    C2p = _round_up(max(C2, 128), 128)            # lane-dense output channels

    # NCHW -> NHWC once (channels-last inside the kernel), spatial zero-pad,
    # cast to bf16 for the MXU.
    x_nhwc = jnp.transpose(x, (0, 2, 3, 1))
    x_pad = jnp.pad(x_nhwc, ((0, 0), (p, p), (p, p), (0, 0))).astype(mxu_dtype)

    # Fold BN scale into the weight; rearrange OIHW -> (kh, kw, C1, C2pad).
    inv_std = jax.lax.rsqrt(running_var.astype(jnp.float32) + eps)
    scale = gamma.astype(jnp.float32) * inv_std                       # (C2,)
    shift = beta.astype(jnp.float32) - running_mean.astype(jnp.float32) * scale
    w_khwc = jnp.transpose(weight.astype(jnp.float32), (2, 3, 1, 0)) * scale
    w_khwc = jnp.pad(w_khwc, ((0, 0), (0, 0), (0, 0), (0, C2p - C2)))
    w_khwc = w_khwc.astype(mxu_dtype)                                 # (k,k,C1,C2p)
    shift_p = jnp.pad(shift, (0, C2p - C2)).reshape(1, C2p)           # (1, C2p)

    kernel = _make_conv_bn_act_kernel(k, s, d, OW, act_type)

    itemsize_in = jnp.dtype(mxu_dtype).itemsize
    flops = 2 * N * OH * OW * k * k * C1 * C2p
    transcendentals = N * OH * OW * C2p if act_type == 'silu' else 0
    bytes_accessed = (x_pad.size * itemsize_in
                      + w_khwc.size * itemsize_in
                      + N * OH * OW * C2p * jnp.dtype(x.dtype).itemsize)

    out = pl.pallas_call(
        kernel,
        out_shape=jax.ShapeDtypeStruct((N, OH, OW, C2p), x.dtype),
        grid_spec=pltpu.PrefetchScalarGridSpec(
            num_scalar_prefetch=0,
            grid=(N, OH, k),                      # kh = innermost reduction axis
            in_specs=[
                # one padded input row; H block size 1 -> element-exact index_map
                pl.BlockSpec((1, 1, Wp, C1),
                             lambda n, oh, kh: (n, oh * s + kh * d, 0, 0)),
                # weight slice for this tap row
                pl.BlockSpec((1, k, C1, C2p),
                             lambda n, oh, kh: (kh, 0, 0, 0)),
                # BN shift (resident)
                pl.BlockSpec((1, C2p), lambda n, oh, kh: (0, 0)),
            ],
            out_specs=pl.BlockSpec((1, 1, OW, C2p),
                                   lambda n, oh, kh: (n, oh, 0, 0)),
            scratch_shapes=[pltpu.VMEM((OW, C2p), jnp.float32)],
        ),
        compiler_params=pltpu.CompilerParams(
            dimension_semantics=("parallel", "parallel", "arbitrary"),
            vmem_limit_bytes=32 * 1024 * 1024),
        cost_estimate=pl.CostEstimate(flops=flops,
                                      transcendentals=transcendentals,
                                      bytes_accessed=bytes_accessed),
    )(x_pad, w_khwc, shift_p)

    out = out[..., :C2]                           # drop lane padding
    return jnp.transpose(out, (0, 3, 1, 2))       # NHWC -> NCHW (module contract)


# --------------------------- pure-JAX reference ------------------------------

def _reference(x, weight, gamma, beta, mean, var, k, p, s, d, act_type, eps=1e-5):
    y = jax.lax.conv_general_dilated(
        x, weight, window_strides=(s, s), padding=((p, p), (p, p)),
        rhs_dilation=(d, d), dimension_numbers=('NCHW', 'OIHW', 'NCHW'))
    inv_std = 1.0 / jnp.sqrt(var + eps)
    y = y * (gamma * inv_std).reshape(1, -1, 1, 1) + \
        (beta - mean * gamma * inv_std).reshape(1, -1, 1, 1)
    if act_type == 'silu':
        y = y * jax.nn.sigmoid(y)
    elif act_type == 'lrelu':
        y = jnp.where(y >= 0.0, y, 0.1 * y)
    return y


# ---------------------------------- main -------------------------------------

if __name__ == "__main__":
    # Conv(c1=4, c2=8, k=3, p=1, s=1, d=1, act_type='silu', depthwise=False)
    c1, c2, k, p, s, d = 4, 8, 3, 1, 1, 1
    act_type = 'silu'
    N, H, W = 2, 16, 16

    key = jax.random.PRNGKey(0)
    kx, kw, kg, kb, km, kv = jax.random.split(key, 6)

    x = jax.random.normal(kx, (N, c1, H, W), dtype=jnp.float32)
    weight = jax.random.normal(kw, (c2, c1, k, k), dtype=jnp.float32) * 0.1
    gamma = jax.random.uniform(kg, (c2,), dtype=jnp.float32, minval=0.5, maxval=1.5)
    beta = jax.random.normal(kb, (c2,), dtype=jnp.float32) * 0.1
    running_mean = jax.random.normal(km, (c2,), dtype=jnp.float32) * 0.1
    running_var = jax.random.uniform(kv, (c2,), dtype=jnp.float32, minval=0.5, maxval=1.5)

    fwd = jax.jit(functools.partial(conv_bn_act, k=k, p=p, s=s, d=d,
                                    act_type=act_type))
    out = fwd(x, weight, gamma, beta, running_mean, running_var)
    out = jax.block_until_ready(out)

    ref = _reference(x, weight, gamma, beta, running_mean, running_var,
                     k, p, s, d, act_type)
    assert out.shape == ref.shape == (N, c2, H, W)
    # bf16 MXU inputs (f32 accumulation) -> compare with a bf16-appropriate tolerance.
    assert jnp.allclose(out, ref, atol=3e-2, rtol=3e-2), "mismatch vs reference"

    print("KERNEL_OK")
</pallas_src>

<mosaic_0001>
module attributes {stable_mosaic.version = 11 : i64} {
  func.func @kernel(%arg0: i32, %arg1: i32, %arg2: i32, %arg3: memref<1x1x18x4xbf16, #tpu.memory_space<vmem>>, %arg4: memref<1x3x4x128xbf16, #tpu.memory_space<vmem>>, %arg5: memref<1x128xf32, #tpu.memory_space<vmem>>, %arg6: memref<1x1x16x128xf32, #tpu.memory_space<vmem>>, %arg7: memref<16x128xf32, #tpu.memory_space<vmem>>) attributes {dimension_semantics = [#tpu.dimension_semantics<parallel>, #tpu.dimension_semantics<parallel>, #tpu.dimension_semantics<arbitrary>], iteration_bounds = array<i64: 2, 16, 3>, scalar_prefetch = 0 : i64, scratch_operands = 1 : i64, tpu.core_type = #tpu.core_type<tc>, window_params = [{transform_indices = @transform_0, window_bounds = array<i64: 1, 1, 18, 4>}, {transform_indices = @transform_1, window_bounds = array<i64: 1, 3, 4, 128>}, {pipeline_mode = #tpu.pipeline_mode<synchronous>, transform_indices = @transform_2, window_bounds = array<i64: 1, 128>}, {transform_indices = @transform_3, window_bounds = array<i64: 1, 1, 16, 128>}]} {
    %c0_i32 = arith.constant 0 : i32
    %0 = arith.cmpi eq, %arg2, %c0_i32 : i32
    %1 = arith.extui %0 : i1 to i32
    %c0_i32_0 = arith.constant 0 : i32
    %2 = arith.cmpi ne, %1, %c0_i32_0 : i32
    scf.if %2 {
      %cst_29 = arith.constant 0.000000e+00 : f32
      %26 = vector.broadcast %cst_29 : f32 to vector<16x128xf32>
      %c0_30 = arith.constant 0 : index
      %c0_31 = arith.constant 0 : index
      %27 = vector.load %arg7[%c0_30, %c0_31] : memref<16x128xf32, #tpu.memory_space<vmem>>, vector<16x128xf32>
      tpu.vector_store %arg7[%c0_30, %c0_31], %26 {strides = array<i32>} : memref<16x128xf32, #tpu.memory_space<vmem>>, vector<16x128xf32>,
    } else {
    }
    %c0 = arith.constant 0 : index
    %c0_1 = arith.constant 0 : index
    %3 = vector.load %arg7[%c0, %c0_1] : memref<16x128xf32, #tpu.memory_space<vmem>>, vector<16x128xf32>
    %c0_2 = arith.constant 0 : index
    %c0_3 = arith.constant 0 : index
    %c0_4 = arith.constant 0 : index
    %c0_5 = arith.constant 0 : index
    %4 = vector.load %arg3[%c0_2, %c0_3, %c0_4, %c0_5] : memref<1x1x18x4xbf16, #tpu.memory_space<vmem>>, vector<1x1x16x4xbf16>
    %5 = vector.shape_cast %4 : vector<1x1x16x4xbf16> to vector<16x4xbf16>
    %c0_6 = arith.constant 0 : index
    %c0_7 = arith.constant 0 : index
    %c0_8 = arith.constant 0 : index
    %c0_9 = arith.constant 0 : index
    %6 = vector.load %arg4[%c0_6, %c0_7, %c0_8, %c0_9] : memref<1x3x4x128xbf16, #tpu.memory_space<vmem>>, vector<1x1x4x128xbf16>
    %7 = vector.shape_cast %6 : vector<1x1x4x128xbf16> to vector<4x128xbf16>
    %cst = arith.constant dense<0.000000e+00> : vector<16x128xf32>
    %8 = tpu.matmul %5, %7, %cst {dimension_numbers = #tpu.dot_dimension_numbers<[1], [0], [0], [1], [0, 0, 1, 1], [], []>} : vector<16x4xbf16>, vector<4x128xbf16>, vector<16x128xf32> -> vector<16x128xf32>
    %9 = arith.addf %3, %8 : vector<16x128xf32>
    %c0_10 = arith.constant 0 : index
    %c0_11 = arith.constant 0 : index
    %c1 = arith.constant 1 : index
    %c0_12 = arith.constant 0 : index
    %10 = vector.load %arg3[%c0_10, %c0_11, %c1, %c0_12] : memref<1x1x18x4xbf16, #tpu.memory_space<vmem>>, vector<1x1x16x4xbf16>
    %11 = vector.shape_cast %10 : vector<1x1x16x4xbf16> to vector<16x4xbf16>
    %c0_13 = arith.constant 0 : index
    %c1_14 = arith.constant 1 : index
    %c0_15 = arith.constant 0 : index
    %c0_16 = arith.constant 0 : index
    %12 = vector.load %arg4[%c0_13, %c1_14, %c0_15, %c0_16] : memref<1x3x4x128xbf16, #tpu.memory_space<vmem>>, vector<1x1x4x128xbf16>
    %13 = vector.shape_cast %12 : vector<1x1x4x128xbf16> to vector<4x128xbf16>
    %cst_17 = arith.constant dense<0.000000e+00> : vector<16x128xf32>
    %14 = tpu.matmul %11, %13, %cst_17 {dimension_numbers = #tpu.dot_dimension_numbers<[1], [0], [0], [1], [0, 0, 1, 1], [], []>} : vector<16x4xbf16>, vector<4x128xbf16>, vector<16x128xf32> -> vector<16x128xf32>
    %15 = arith.addf %9, %14 : vector<16x128xf32>
    %c0_18 = arith.constant 0 : index
    %c0_19 = arith.constant 0 : index
    %c2 = arith.constant 2 : index
    %c0_20 = arith.constant 0 : index
    %16 = vector.load %arg3[%c0_18, %c0_19, %c2, %c0_20] : memref<1x1x18x4xbf16, #tpu.memory_space<vmem>>, vector<1x1x16x4xbf16>
    %17 = vector.shape_cast %16 : vector<1x1x16x4xbf16> to vector<16x4xbf16>
    %c0_21 = arith.constant 0 : index
    %c2_22 = arith.constant 2 : index
    %c0_23 = arith.constant 0 : index
    %c0_24 = arith.constant 0 : index
    %18 = vector.load %arg4[%c0_21, %c2_22, %c0_23, %c0_24] : memref<1x3x4x128xbf16, #tpu.memory_space<vmem>>, vector<1x1x4x128xbf16>
    %19 = vector.shape_cast %18 : vector<1x1x4x128xbf16> to vector<4x128xbf16>
    %cst_25 = arith.constant dense<0.000000e+00> : vector<16x128xf32>
    %20 = tpu.matmul %17, %19, %cst_25 {dimension_numbers = #tpu.dot_dimension_numbers<[1], [0], [0], [1], [0, 0, 1, 1], [], []>} : vector<16x4xbf16>, vector<4x128xbf16>, vector<16x128xf32> -> vector<16x128xf32>
    %21 = arith.addf %15, %20 : vector<16x128xf32>
    %c0_26 = arith.constant 0 : index
    %c0_27 = arith.constant 0 : index
    %22 = vector.load %arg7[%c0_26, %c0_27] : memref<16x128xf32, #tpu.memory_space<vmem>>, vector<16x128xf32>
    tpu.vector_store %arg7[%c0_26, %c0_27], %21 {strides = array<i32>} : memref<16x128xf32, #tpu.memory_space<vmem>>, vector<16x128xf32>,
    %c2_i32 = arith.constant 2 : i32
    %23 = arith.cmpi eq, %arg2, %c2_i32 : i32
    %24 = arith.extui %23 : i1 to i32
    %c0_i32_28 = arith.constant 0 : i32
    %25 = arith.cmpi ne, %24, %c0_i32_28 : i32
    scf.if %25 {
      %c0_29 = arith.constant 0 : index
      %c0_30 = arith.constant 0 : index
      %26 = vector.load %arg7[%c0_29, %c0_30] : memref<16x128xf32, #tpu.memory_space<vmem>>, vector<16x128xf32>
      %c0_31 = arith.constant 0 : index
      %c0_32 = arith.constant 0 : index
      %27 = vector.load %arg5[%c0_31, %c0_32] : memref<1x128xf32, #tpu.memory_space<vmem>>, vector<1x128xf32>
      %28 = vector.broadcast %27 : vector<1x128xf32> to vector<16x128xf32>
      %29 = arith.addf %26, %28 : vector<16x128xf32>
      %cst_33 = arith.constant 0.000000e+00 : f32
      %30 = vector.broadcast %cst_33 : f32 to vector<16x128xf32>
      %31 = arith.subf %30, %29 : vector<16x128xf32>
      %32 = math.exp %31 : vector<16x128xf32>
      %cst_34 = arith.constant 1.000000e+00 : f32
      %33 = vector.broadcast %cst_34 : f32 to vector<16x128xf32>
      %34 = arith.addf %33, %32 : vector<16x128xf32>
      %35 = tpu.reciprocal %34 {approx = true} : vector<16x128xf32> -> vector<16x128xf32>
      %36 = arith.mulf %29, %35 : vector<16x128xf32>
      %c0_35 = arith.constant 0 : index
      %c0_36 = arith.constant 0 : index
      %c0_37 = arith.constant 0 : index
      %c0_38 = arith.constant 0 : index
      %37 = vector.load %arg6[%c0_35, %c0_36, %c0_37, %c0_38] : memref<1x1x16x128xf32, #tpu.memory_space<vmem>>, vector<1x1x16x128xf32>
      %38 = vector.shape_cast %37 : vector<1x1x16x128xf32> to vector<16x128xf32>
      %39 = vector.shape_cast %36 : vector<16x128xf32> to vector<1x1x16x128xf32>
      tpu.vector_store %arg6[%c0_35, %c0_36, %c0_37, %c0_38], %39 {strides = array<i32>} : memref<1x1x16x128xf32, #tpu.memory_space<vmem>>, vector<1x1x16x128xf32>,
    } else {
    }
    return
  }
  func.func @transform_0(%arg0: i32, %arg1: i32, %arg2: i32) -> (i32, i32, i32, i32) {
    %c1_i32 = arith.constant 1 : i32
    %0 = arith.muli %arg1, %c1_i32 : i32
    %c1_i32_0 = arith.constant 1 : i32
    %1 = arith.muli %arg2, %c1_i32_0 : i32
    %2 = arith.addi %0, %1 : i32
    %c0_i32 = arith.constant 0 : i32
    %c0_i32_1 = arith.constant 0 : i32
    %c0_i32_2 = arith.constant 0 : i32
    return %arg0, %2, %c0_i32, %c0_i32_1 : i32, i32, i32, i32
  }
  func.func @transform_1(%arg0: i32, %arg1: i32, %arg2: i32) -> (i32, i32, i32, i32) {
    %c0_i32 = arith.constant 0 : i32
    %c0_i32_0 = arith.constant 0 : i32
    %c0_i32_1 = arith.constant 0 : i32
    %c0_i32_2 = arith.constant 0 : i32
    return %arg2, %c0_i32, %c0_i32_0, %c0_i32_1 : i32, i32, i32, i32
  }
  func.func @transform_2(%arg0: i32, %arg1: i32, %arg2: i32) -> (i32, i32) {
    %c0_i32 = arith.constant 0 : i32
    %c0_i32_0 = arith.constant 0 : i32
    %c0_i32_1 = arith.constant 0 : i32
    return %c0_i32, %c0_i32_0 : i32, i32
  }
  func.func @transform_3(%arg0: i32, %arg1: i32, %arg2: i32) -> (i32, i32, i32, i32) {
    %c0_i32 = arith.constant 0 : i32
    %c0_i32_0 = arith.constant 0 : i32
    %c0_i32_1 = arith.constant 0 : i32
    return %arg0, %arg1, %c0_i32, %c0_i32_0 : i32, i32, i32, i32
  }
}

</mosaic_0001>

<bundles_post_ra>
// kernel: conv_bn_act.1
= control target key start
LH: loop header
LB: loop body
LE: loop exit
PB: predicated region body
PF: predicated region fallthrough
CT: control target
= control target key end

     0   :  { %s680_s12 = smov 0   ;;  %s682_s13 = smov 0   ;;  %s774_s0 = inlined_call_operand.vmem [shape: bf16[2,18,18,4], index: 0, kind: input, shape index: {}]   ;;  %s775_s1 = inlined_call_operand.vmem [shape: bf16[3,3,4,128], index: 1, kind: input, shape index: {}]   ;;  %s776_s2 = inlined_call_operand.vmem [shape: f32[1,128], index: 2, kind: input, shape index: {}]   ;;  %s777_s3 = inlined_call_operand.vmem [shape: f32[2,16,16,128], index: 3, kind: output, shape index: {}]  }
   0x1   :  { %s684_s14 = smov 0   ;;  %s686_s15 = smov 0  }
   0x2   :  { %s688_s16 = smov 0   ;;  %s690_s17 = smov 0  }
   0x3   :  { %s692_s18 = smov 0  }
   0x4 LB: > { %s25_s19 = sadd.s32 1, %s645_s15  ;;  %s28_s20 = sadd.s32 1, %s649_s16  ;;  %s657_s18 = sphi %s692_s18, %s13_s18   ;;  %s653_s17 = sphi %s690_s17, %s785_s17   ;;  %s649_s16 = sphi %s688_s16, %s784_s16   ;;  %s645_s15 = sphi %s686_s15, %s783_s15   ;;  %s641_s14 = sphi %s684_s14, %s782_s14   ;;  %s637_s13 = sphi %s682_s13, %s781_s13   ;;  %s633_s12 = sphi %s680_s12, %s780_s12  }
   0x5   : > { %p26_p0 = scmp.ge.s32.totalorder %s25_s19, 3  ;;  %p507_p1 = scmp.ge.s32.totalorder %s657_s18, 1 }
   0x6   : > { %p178_p2 = scmp.lt.s32.totalorder %s657_s18, 97  ;;  %s32_s21 = sadd.s32 1, %s653_s17 }
   0x7   : > { %s787_s19 = smov (%p26_p0, %s25_s19), 0  ;;  %s789_s20 = smov (!%p26_p0, %s28_s20), %s649_s16 }
   0x8   : > { %p179_p3 = pnand %p507_p1, %p178_p2  ;;  %p30_p4 = scmp.ge.s32.totalorder %s789_s20, 16 }
   0x9   : > { %s216_s22 = sadd.s32 (!%p179_p3), %s633_s12, %s637_s13  ;;  %p217_p6 = scmp.lt.s32.totalorder (!%p179_p3), %s641_s14, 1 }
   0xa   : > { %s791_s20 = smov (%p30_p4, %s789_s20), 0  ;;  %s793_s21 = smov (!%p30_p4, %s32_s21), %s653_s17 }
   0xb   : > { %p34_p5 = scmp.ge.s32.totalorder %s793_s21, 2  ;;  %182 = sbr.rel (%p179_p3) target bundleno = 217 (0xd9), region = 32 }
   0xc   : > { %p219_p7 = scmp.lt.s32.totalorder (!%p179_p3), %s216_s22, 17  ;;  %p227_p8 = scmp.lt.s32.totalorder (!%p179_p3), %s633_s12, 2 }
   0xd   : > { %s795_s21 = smov (%p34_p5, %s793_s21), 0  ;;  %p234_p9 = scmp.lt.s32.totalorder (!%p179_p3), %s637_s13, 15 }
   0xe   : > { %778 = sst [smem:[#allocation3_spill]] %s795_s21  ;;  %p513_p10 = scmp.ne.s32.totalorder (!%p179_p3), %s633_s12, 0 }
  0x10   : > { %s797_s14 = smov (!%p217_p6, %s641_s14), 1  ;;  %s799_s22 = smov (!%p219_p7, %s216_s22), 17 }
  0x11   : > { %s535_s23 = smul.u32 54, %s797_s14  ;;  %s511_s8 = sshll.u32 %s797_s14, 5 }
  0x12   : > { %s534_s24 = smul.u32 3, %s799_s22  ;;  %s801_s13 = smov (!%p234_p9, %s637_s13), 15 }
  0x13   : > { %s228_s25 = scalar_select %p227_p8, %s633_s12, 2 }
  0x14   : > { %s223_s26 = sadd.s32 %s535_s23, %s534_s24  ;;  %s510_s9 = sshll.u32 %s801_s13, 1 }
  0x15   : > { %s508_s27 = sshll.u32 %s223_s26, 2  ;;  %s536_s28 = smul.u32 6, %s228_s25 }
  0x16   : > { %s225_s4 = scalar_lea.vmem %s774_s0, %s508_s27  ;;  %s238_s10 = sadd.s32 %s511_s8, %s510_s9 }
  0x17   : > { %s231_s7 = scalar_lea.vmem %s775_s1, %s536_s28  ;;  %s512_s11 = sshll.u32 %s238_s10, 3 }
  0x18   : > { %s741_s23 = scalar_lea.vmem %s777_s3, %s512_s11  ;;  %245 = sbr.rel (%p513_p10) target bundleno = 32 (0x20), region = 36 }
  0x1d   : > { %v659_v0 = vmov 0.0  }
  0x1e   : > { %246 = vst [vmem:[#allocation2] sm:$0xff] %v659_v0 }
  0x1f   : > { %247 = vst [vmem:[#allocation2 + $0x8] sm:$0xff] %v659_v0 }
  0x20 PF: > { %v252_v1 = vld [vmem:[%s231_s7] sm:$0x3]  ;;  %vm262_vm0 = vcmask 1041408   ;;  %vm258_vm1 = vcmask 31744   ;;  %v521_v4 = vld [vmem:[%s231_s7 + $0x4] sm:$0x3] }
  0x21   : > { %v526_v2 = vld [vmem:[%s225_s4] sm:$0xff]  ;;  %v264_v3 = vsel %vm262_vm0, %v252_v1, 0  ;;  %v344_v7 = vsel %vm262_vm0, %v521_v4, 0  ;;  %v284_v10 = vld [vmem:[%s225_s4 + $0x8] sm:$0x1]  ;;  %vm336_vm2 = vcmask 1046528  }
  0x22   : > { %v519_v5 = vld [vmem:[%s231_s7 + $0x2] sm:$0x3]  ;;  %273 = vmatpush.bf16.msra.mxu0 %v264_v3  ;;  %v531_v9 = vld [vmem:[%s225_s4] sm:$0xf0]  ;;  %353 = vmatpush.bf16.msra.mxu2 %v344_v7  ;;  %v292_v11 = vunpack.c.l.b16 %v284_v10  ;;  %vm295_vm3 = vsmask.f32 7424 }
  0x23   : > { %v528_v6 = vld [vmem:[%s225_s4] sm:$0xff]   ;;  %v312_v8 = vsel %vm262_vm0, %v519_v5, 0  ;;  %p523_p11 = scmp.ne.s32.totalorder %s633_s12, 2 }
  0x24   : > { %321 = vmatpush.bf16.msra.mxu1 %v312_v8  ;;  %v532_v12 = vld [vmem:[%s225_s4] sm:$0xe]  ;;  %v297_v13 = vshrl.u32 %v528_v6, 16  ;;  %v299_v14 = vshll.u32 %v528_v6, 16  ;;  %v294_v16 = vpack.c.b16 %v292_v11, %v292_v11 }
  0x25   : > { %v533_v15 = vor.u32 %v532_v12, %v531_v9  ;;  %518 = vmatmul.msk.bf16.vlgmr.msra.gmra.mxu0 %vm258_vm1, %v526_v2  ;;  %v248_v25 = vld [vmem:[#allocation2] sm:$0xff] }
  0x26   : > { %v301_v17 = vrot.slane %v299_v14, 1  ;;  %v338_v19 = vrot.slane %v294_v16, 1  ;;  %v304_v21 = vshll.u32 %v294_v16, 16  ;;  %v249_v32 = vld [vmem:[#allocation2 + $0x8] sm:$0xff] }
  0x27   : > { %v337_v18 = vrot.slane %v533_v15, 1 }
  0x28   : > { %v302_v20 = vor.u32 %v301_v17, %v297_v13  ;;  %v306_v23 = vrot.slane %v304_v21, 1 }
  0x29   : > { %v339_v22 = vsel %vm336_vm2, %v337_v18, %v338_v19 }
  0x2a   : > { %522 = vmatmul.msk.bf16.vlgmr.msra.gmra.mxu2 %vm258_vm1, %v339_v22  ;;  %v307_v24 = vsel %vm295_vm3, %v302_v20, %v306_v23 }
  0x2b   : > { %520 = vmatmul.msk.bf16.vlgmr.msra.gmra.mxu1 %vm258_vm1, %v307_v24 }
  0xa2   : > { %v275_v26 = vpop.f32.mrf.mxu0 }
  0xa3   : > { %v280_v27 = vadd.f32 %v275_v26, %v248_v25 }
  0xa8   : > { %v323_v28 = vpop.f32.mrf.mxu1 }
  0xa9   : > { %v328_v29 = vadd.f32 %v323_v28, %v280_v27 }
  0xaa   : > { %v277_v33 = vpop.f32.mrf.mxu0 }
  0xab   : > { %v281_v35 = vadd.f32 %v277_v33, %v249_v32 }
  0xad   : > { %v355_v30 = vpop.f32.mrf.mxu2 }
  0xae   : > { %v360_v31 = vadd.f32 %v355_v30, %v328_v29 }
  0xb0   : > { %362 = vst [vmem:[#allocation2] sm:$0xff] %v360_v31  ;;  %v325_v34 = vpop.f32.mrf.mxu1 }
  0xb1   : > { %v329_v36 = vadd.f32 %v325_v34, %v281_v35 }
  0xb4   : > { %367 = sbr.rel (%p523_p11) target bundleno = 217 (0xd9), region = 40 }
  0xb5   : > { %v357_v37 = vpop.f32.mrf.mxu2 }
  0xb6   : > { %v361_v38 = vadd.f32 %v357_v37, %v329_v36 }
  0xb8   : > { %363 = vst [vmem:[#allocation2 + $0x8] sm:$0xff] %v361_v38 }
  0xb9   : > { %v368_v39 = vld [vmem:[#allocation2] sm:$0xff] }
  0xba   : > { %v594_v40 = vld [vmem:[%s776_s2] ss:$0 sm:$0xff] }
  0xbb   : > { %v374_v42 = vadd.f32 %v594_v40, %v368_v39 }
  0xbd   : > { %v376_v44 = vsub.f32 0.0, %v374_v42 }
  0xbf   : > { %v369_v41 = vld [vmem:[#allocation2 + $0x8] sm:$0xff]  ;;  %v378_v46 = vmul.f32 1.442695, %v376_v44 }
  0xc0   : > { %v375_v43 = vadd.f32 %v594_v40, %v369_v41 }
  0xc1   : > { %595 = vpow2.f32 %v378_v46 }
  0xc2   : > { %v377_v45 = vsub.f32 0.0, %v375_v43 }
  0xc4   : > { %v380_v47 = vmul.f32 1.442695, %v377_v45 }
  0xc6   : > { %597 = vpow2.f32 %v380_v47 }
  0xc7   : > { %v596_v48 = vpop.eup %595 }
  0xc8   : > { %v382_v50 = vadd.f32 1.0, %v596_v48 }
  0xca   : > { %599 = vrcp.f32 %v382_v50 }
  0xcc   : > { %v598_v49 = vpop.eup %597 }
  0xcd   : > { %v383_v51 = vadd.f32 1.0, %v598_v49 }
  0xcf   : > { %601 = vrcp.f32 %v383_v51 }
  0xd0   : > { %v600_v52 = vpop.eup %599 }
  0xd1   : > { %v386_v54 = vmul.f32 %v600_v52, %v374_v42 }
  0xd3   : > { %388 = vst [vmem:[%s741_s23] sm:$0xff] %v386_v54 }
  0xd5   : > { %v602_v53 = vpop.eup %601 }
  0xd6   : > { %v387_v55 = vmul.f32 %v602_v53, %v375_v43 }
  0xd8   : > { %389 = vst [vmem:[%s741_s23 + $0x8] sm:$0xff] %v387_v55 }
  0xd9 PF: > { %s13_s18 = sadd.s32 1, %s657_s18   ;;  %s779_s21 = sld [smem:[#allocation3_spill]] }
  0xda   : > { %p10_p12 = scmp.ge.s32.totalorder %s13_s18, 98   ;;  %s780_s12 = smov %s645_s15 }
  0xdb   : > { %s781_s13 = smov %s649_s16  ;;  %s782_s14 = smov %s653_s17 }
  0xdc   : > { %s783_s15 = smov %s787_s19  ;;  %s784_s16 = smov %s791_s20 }
  0xdd   :  { %12 = sbr.rel (!%p10_p12) target bundleno = 4 (0x4), region = 75 }
  0xdf   : > { %s785_s17 = smov %s779_s21 }

</bundles_post_ra>
